<compile_context>
chip_gen: v7x
topology: tpu7x:2x2x1
jax: 0.10.0
libtpu: 0.0.40
codegen_flags: <defaults>
</compile_context>

<pallas_src>
import jax
import jax.numpy as jnp
from jax import lax
from jax.experimental import pallas as pl
from jax.experimental.pallas import tpu as pltpu


# ------------------------- Pallas kernel ------------------------------------
def lstm_linear_relu_kernel(
    x_ref,        # (T*B, I)    time-major, batch-padded, flattened input
    w_ih_ref,     # (I, 4H)     input->gates weights (i/f/o cols pre-scaled by 0.5)
    w_hh_ref,     # (4H, 4H)    hidden->gates weights (rows >= H zero, i/f/o cols pre-scaled)
    b_ref,        # (1, 4H)     fused bias b_ih + b_hh (i/f/o cols pre-scaled)
    w_out_ref,    # (4H, OUTP)  linear weights (rows >= H zero, cols >= OUT zero)
    b_out_ref,    # (1, OUTP)   linear bias (cols >= OUT zero)
    o_ref,        # (B, OUTP)   output (lane-dense, padded)
):
    TB = x_ref.shape[0]
    B = o_ref.shape[0]
    G4 = w_hh_ref.shape[0]          # 4H
    H = G4 // 4
    T = TB // B

    # Hoisted input projection + fused bias: ONE batched MXU call for all T
    # timesteps, kept as a value (T*B x 4H f32 = 8 vregs) -- no VMEM scratch.
    xproj = (
        jnp.dot(x_ref[...], w_ih_ref[...], preferred_element_type=jnp.float32)
        + b_ref[...]
    )

    # Loop-invariant weight load hoisted once.
    # TODO(synk): per review, pltpu.matmul_push_rhs/matmul_acc_lhs/matmul_pop
    # could pin W_hh in MXU weight registers across the 8-step chain; jnp.dot
    # is kept for portable lowering across v5e/v6e/v7x.
    w_hh = w_hh_ref[...]                                       # (4H, 4H)

    h = jnp.zeros((B, G4), jnp.float32)                        # padded hidden vreg
    c = jnp.zeros((B, G4), jnp.float32)                        # padded cell vreg

    # Fully unrolled recurrence (T is small & static) with static slices.
    for t in range(T):
        gates = xproj[t * B:(t + 1) * B, :] + jnp.dot(
            h, w_hh, preferred_element_type=jnp.float32
        )                                                      # (B, 4H), layout [ i | f | g | o ]
        # Single full-vreg tanh (EUP). i/f/o columns were pre-scaled by 0.5,
        # so sigmoid(orig) == 0.5*tanh(0.5*orig) + 0.5; g column is raw tanh.
        t_all = jnp.tanh(gates)                                # tanh frame  (valid on g lanes)
        s_all = 0.5 * t_all + 0.5                              # sigmoid frame (valid on i/f/o lanes)
        # Align f/g/o blocks onto the i-lanes [0, H) with XLU rolls
        # (no mask/select needed -- each frame is read only on its own lanes).
        f_a = pltpu.roll(s_all, 3 * H, axis=1)                 # f-sigmoid -> lanes [0, H)
        g_a = pltpu.roll(t_all, 2 * H, axis=1)                 # g-tanh    -> lanes [0, H)
        o_a = pltpu.roll(s_all, 1 * H, axis=1)                 # o-sigmoid -> lanes [0, H)
        # Lanes [0, H) carry the real cell/hidden state. Lanes [H, 4H) carry
        # bounded garbage (|c| grows at most +1 per step, i.e. <= T); it is
        # killed by the zero rows [H, 4H) of w_hh and w_out, so it never
        # contributes to the real lanes or the output.
        c = f_a * c + s_all * g_a
        h = o_a * jnp.tanh(c)

    # input = input[:, -1, :]  ->  Linear -> ReLU.
    y = (
        jnp.dot(h, w_out_ref[...], preferred_element_type=jnp.float32)
        + b_out_ref[...]
    )
    o_ref[...] = jnp.maximum(y, 0.0)                           # full-vreg, lane-dense store


# ------------------------- one-time init + jitted forward --------------------
def init_my_sequential(params):
    """One-time parameter preprocessing. Returns a jitted forward(x) -> (B, OUT)."""
    w_ih, w_hh, b_ih, b_hh, w_lin, b_lin = params
    H = w_hh.shape[1]
    OUT = w_lin.shape[0]
    G4 = 4 * H

    SUB, LANES = 8, 128
    OUT_pad = ((OUT + LANES - 1) // LANES) * LANES  # lane-dense output store

    # Pre-scale sigmoid-gate (i, f, o) columns by 0.5 so the kernel uses one
    # full-vreg tanh:  sigmoid(v) = 0.5 * tanh(0.5 * v) + 0.5
    col = jnp.arange(G4)
    is_g = (col >= 2 * H) & (col < 3 * H)
    scale = jnp.where(is_g, 1.0, 0.5).astype(jnp.float32)               # (4H,)

    w_ih_t = w_ih.T.astype(jnp.float32) * scale[None, :]                # (I, 4H)
    b_fused = ((b_ih + b_hh).astype(jnp.float32) * scale).reshape(1, G4)
    # Zero-pad hidden->gates weights to (4H, 4H): garbage lanes of the padded
    # hidden vreg hit zero rows, so the recurrent matmul stays correct.
    w_hh_p = jnp.zeros((G4, G4), jnp.float32).at[:H, :].set(
        w_hh.T.astype(jnp.float32) * scale[None, :]
    )
    w_out_p = jnp.zeros((G4, OUT_pad), jnp.float32).at[:H, :OUT].set(
        w_lin.T.astype(jnp.float32)
    )
    b_out_p = jnp.zeros((1, OUT_pad), jnp.float32).at[0, :OUT].set(
        b_lin.astype(jnp.float32)
    )

    vmem = pl.BlockSpec(memory_space=pltpu.MemorySpace.VMEM)

    @jax.jit
    def forward(x):
        """x: (B, T, I) batch-first, float32. Returns (B, OUT)."""
        B, T, I = x.shape
        B_pad = ((B + SUB - 1) // SUB) * SUB       # full f32 sublane tile

        # Per-call input layout only (fused by XLA under this jit).
        x_tm = jnp.transpose(x, (1, 0, 2))                         # (T, B, I)
        x_tm = jnp.pad(x_tm, ((0, 0), (0, B_pad - B), (0, 0)))     # pad batch
        x_flat = x_tm.reshape(T * B_pad, I).astype(jnp.float32)    # (T*B, I)

        out_pad = pl.pallas_call(
            lstm_linear_relu_kernel,
            out_shape=jax.ShapeDtypeStruct((B_pad, OUT_pad), jnp.float32),
            in_specs=[vmem] * 6,
            out_specs=vmem,
        )(x_flat, w_ih_t, w_hh_p, b_fused, w_out_p, b_out_p)
        # Note: for scaled-up B/T (esp. v7x) switch to a ("parallel",) batch grid
        # and tile the input projection over T chunks instead of one slab.
        return out_pad[:B, :OUT]

    return forward


# ------------------------- pure-JAX reference --------------------------------
def reference_forward(x, params):
    w_ih, w_hh, b_ih, b_hh, w_lin, b_lin = params
    B, T, I = x.shape
    H = w_hh.shape[1]

    def scan_fn(carry, x_t):
        h, c = carry
        gates = x_t @ w_ih.T + h @ w_hh.T + b_ih + b_hh
        i_g = jax.nn.sigmoid(gates[:, 0 * H:1 * H])
        f_g = jax.nn.sigmoid(gates[:, 1 * H:2 * H])
        g_g = jnp.tanh(gates[:, 2 * H:3 * H])
        o_g = jax.nn.sigmoid(gates[:, 3 * H:4 * H])
        c = f_g * c + i_g * g_g
        h = o_g * jnp.tanh(c)
        return (h, c), None

    h0 = jnp.zeros((B, H), jnp.float32)
    c0 = jnp.zeros((B, H), jnp.float32)
    (h_last, _), _ = lax.scan(scan_fn, (h0, c0), jnp.transpose(x, (1, 0, 2)))
    y = h_last @ w_lin.T + b_lin
    return jnp.maximum(y, 0.0)


# ------------------------- main ----------------------------------------------
if __name__ == "__main__":
    B, T, I, H, OUT = 2, 8, 16, 32, 16

    key = jax.random.PRNGKey(0)
    ks = jax.random.split(key, 7)
    s_lstm = 1.0 / jnp.sqrt(H)   # PyTorch LSTM default init scale
    s_lin = 1.0 / jnp.sqrt(H)    # PyTorch Linear default init scale (fan_in=H)

    params = (
        jax.random.uniform(ks[0], (4 * H, I), jnp.float32, -s_lstm, s_lstm),  # w_ih
        jax.random.uniform(ks[1], (4 * H, H), jnp.float32, -s_lstm, s_lstm),  # w_hh
        jax.random.uniform(ks[2], (4 * H,), jnp.float32, -s_lstm, s_lstm),    # b_ih
        jax.random.uniform(ks[3], (4 * H,), jnp.float32, -s_lstm, s_lstm),    # b_hh
        jax.random.uniform(ks[4], (OUT, H), jnp.float32, -s_lin, s_lin),      # w_lin
        jax.random.uniform(ks[5], (OUT,), jnp.float32, -s_lin, s_lin),        # b_lin
    )
    x = jax.random.normal(ks[6], (B, T, I), jnp.float32)

    forward = init_my_sequential(params)      # one-time parameter prep + jit
    out = jax.block_until_ready(forward(x))   # per-call: only x is processed

    ref = jax.block_until_ready(reference_forward(x, params))
    assert out.shape == (B, OUT)
    assert jnp.allclose(out, ref, atol=1e-5, rtol=1e-5), "mismatch vs reference"

    print("KERNEL_OK")
</pallas_src>

<mosaic_0001>
module attributes {stable_mosaic.version = 11 : i64} {
  func.func @lstm_linear_relu_kernel(%arg0: memref<64x16xf32, #tpu.memory_space<vmem>>, %arg1: memref<16x128xf32, #tpu.memory_space<vmem>>, %arg2: memref<128x128xf32, #tpu.memory_space<vmem>>, %arg3: memref<1x128xf32, #tpu.memory_space<vmem>>, %arg4: memref<128x128xf32, #tpu.memory_space<vmem>>, %arg5: memref<1x128xf32, #tpu.memory_space<vmem>>, %arg6: memref<8x128xf32, #tpu.memory_space<vmem>>) attributes {dimension_semantics = [], scalar_prefetch = 0 : i64, scratch_operands = 0 : i64, tpu.core_type = #tpu.core_type<tc>} {
    %c0 = arith.constant 0 : index
    %c0_0 = arith.constant 0 : index
    %0 = vector.load %arg0[%c0, %c0_0] : memref<64x16xf32, #tpu.memory_space<vmem>>, vector<64x16xf32>
    %c0_1 = arith.constant 0 : index
    %c0_2 = arith.constant 0 : index
    %1 = vector.load %arg1[%c0_1, %c0_2] : memref<16x128xf32, #tpu.memory_space<vmem>>, vector<16x128xf32>
    %cst = arith.constant dense<0.000000e+00> : vector<64x128xf32>
    %2 = tpu.matmul %0, %1, %cst {dimension_numbers = #tpu.dot_dimension_numbers<[1], [0], [0], [1], [0, 0, 1, 1], [], []>} : vector<64x16xf32>, vector<16x128xf32>, vector<64x128xf32> -> vector<64x128xf32>
    %c0_3 = arith.constant 0 : index
    %c0_4 = arith.constant 0 : index
    %3 = vector.load %arg3[%c0_3, %c0_4] : memref<1x128xf32, #tpu.memory_space<vmem>>, vector<1x128xf32>
    %4 = vector.broadcast %3 : vector<1x128xf32> to vector<64x128xf32>
    %5 = arith.addf %2, %4 : vector<64x128xf32>
    %c0_5 = arith.constant 0 : index
    %c0_6 = arith.constant 0 : index
    %6 = vector.load %arg2[%c0_5, %c0_6] : memref<128x128xf32, #tpu.memory_space<vmem>>, vector<128x128xf32>
    %cst_7 = arith.constant 0.000000e+00 : f32
    %7 = vector.broadcast %cst_7 : f32 to vector<8x128xf32>
    %cst_8 = arith.constant 0.000000e+00 : f32
    %8 = vector.broadcast %cst_8 : f32 to vector<8x128xf32>
    %9 = vector.extract_strided_slice %5 {offsets = [0, 0], sizes = [8, 128], strides = [1, 1]} : vector<64x128xf32> to vector<8x128xf32>
    %cst_9 = arith.constant dense<0.000000e+00> : vector<8x128xf32>
    %10 = tpu.matmul %7, %6, %cst_9 {dimension_numbers = #tpu.dot_dimension_numbers<[1], [0], [0], [1], [0, 0, 1, 1], [], []>} : vector<8x128xf32>, vector<128x128xf32>, vector<8x128xf32> -> vector<8x128xf32>
    %11 = arith.addf %9, %10 : vector<8x128xf32>
    %12 = math.tanh %11 : vector<8x128xf32>
    %cst_10 = arith.constant 5.000000e-01 : f32
    %13 = vector.broadcast %cst_10 : f32 to vector<8x128xf32>
    %14 = arith.mulf %13, %12 : vector<8x128xf32>
    %cst_11 = arith.constant 5.000000e-01 : f32
    %15 = vector.broadcast %cst_11 : f32 to vector<8x128xf32>
    %16 = arith.addf %14, %15 : vector<8x128xf32>
    %c96_i32 = arith.constant 96 : i32
    %17 = tpu.dynamic_rotate %16 by %c96_i32 dim 1 : vector<8x128xf32>, i32 -> vector<8x128xf32>
    %c64_i32 = arith.constant 64 : i32
    %18 = tpu.dynamic_rotate %12 by %c64_i32 dim 1 : vector<8x128xf32>, i32 -> vector<8x128xf32>
    %c32_i32 = arith.constant 32 : i32
    %19 = tpu.dynamic_rotate %16 by %c32_i32 dim 1 : vector<8x128xf32>, i32 -> vector<8x128xf32>
    %20 = arith.mulf %17, %8 : vector<8x128xf32>
    %21 = arith.mulf %16, %18 : vector<8x128xf32>
    %22 = arith.addf %20, %21 : vector<8x128xf32>
    %23 = math.tanh %22 : vector<8x128xf32>
    %24 = arith.mulf %19, %23 : vector<8x128xf32>
    %25 = vector.extract_strided_slice %5 {offsets = [8, 0], sizes = [8, 128], strides = [1, 1]} : vector<64x128xf32> to vector<8x128xf32>
    %cst_12 = arith.constant dense<0.000000e+00> : vector<8x128xf32>
    %26 = tpu.matmul %24, %6, %cst_12 {dimension_numbers = #tpu.dot_dimension_numbers<[1], [0], [0], [1], [0, 0, 1, 1], [], []>} : vector<8x128xf32>, vector<128x128xf32>, vector<8x128xf32> -> vector<8x128xf32>
    %27 = arith.addf %25, %26 : vector<8x128xf32>
    %28 = math.tanh %27 : vector<8x128xf32>
    %cst_13 = arith.constant 5.000000e-01 : f32
    %29 = vector.broadcast %cst_13 : f32 to vector<8x128xf32>
    %30 = arith.mulf %29, %28 : vector<8x128xf32>
    %cst_14 = arith.constant 5.000000e-01 : f32
    %31 = vector.broadcast %cst_14 : f32 to vector<8x128xf32>
    %32 = arith.addf %30, %31 : vector<8x128xf32>
    %c96_i32_15 = arith.constant 96 : i32
    %33 = tpu.dynamic_rotate %32 by %c96_i32_15 dim 1 : vector<8x128xf32>, i32 -> vector<8x128xf32>
    %c64_i32_16 = arith.constant 64 : i32
    %34 = tpu.dynamic_rotate %28 by %c64_i32_16 dim 1 : vector<8x128xf32>, i32 -> vector<8x128xf32>
    %c32_i32_17 = arith.constant 32 : i32
    %35 = tpu.dynamic_rotate %32 by %c32_i32_17 dim 1 : vector<8x128xf32>, i32 -> vector<8x128xf32>
    %36 = arith.mulf %33, %22 : vector<8x128xf32>
    %37 = arith.mulf %32, %34 : vector<8x128xf32>
    %38 = arith.addf %36, %37 : vector<8x128xf32>
    %39 = math.tanh %38 : vector<8x128xf32>
    %40 = arith.mulf %35, %39 : vector<8x128xf32>
    %41 = vector.extract_strided_slice %5 {offsets = [16, 0], sizes = [8, 128], strides = [1, 1]} : vector<64x128xf32> to vector<8x128xf32>
    %cst_18 = arith.constant dense<0.000000e+00> : vector<8x128xf32>
    %42 = tpu.matmul %40, %6, %cst_18 {dimension_numbers = #tpu.dot_dimension_numbers<[1], [0], [0], [1], [0, 0, 1, 1], [], []>} : vector<8x128xf32>, vector<128x128xf32>, vector<8x128xf32> -> vector<8x128xf32>
    %43 = arith.addf %41, %42 : vector<8x128xf32>
    %44 = math.tanh %43 : vector<8x128xf32>
    %cst_19 = arith.constant 5.000000e-01 : f32
    %45 = vector.broadcast %cst_19 : f32 to vector<8x128xf32>
    %46 = arith.mulf %45, %44 : vector<8x128xf32>
    %cst_20 = arith.constant 5.000000e-01 : f32
    %47 = vector.broadcast %cst_20 : f32 to vector<8x128xf32>
    %48 = arith.addf %46, %47 : vector<8x128xf32>
    %c96_i32_21 = arith.constant 96 : i32
    %49 = tpu.dynamic_rotate %48 by %c96_i32_21 dim 1 : vector<8x128xf32>, i32 -> vector<8x128xf32>
    %c64_i32_22 = arith.constant 64 : i32
    %50 = tpu.dynamic_rotate %44 by %c64_i32_22 dim 1 : vector<8x128xf32>, i32 -> vector<8x128xf32>
    %c32_i32_23 = arith.constant 32 : i32
    %51 = tpu.dynamic_rotate %48 by %c32_i32_23 dim 1 : vector<8x128xf32>, i32 -> vector<8x128xf32>
    %52 = arith.mulf %49, %38 : vector<8x128xf32>
    %53 = arith.mulf %48, %50 : vector<8x128xf32>
    %54 = arith.addf %52, %53 : vector<8x128xf32>
    %55 = math.tanh %54 : vector<8x128xf32>
    %56 = arith.mulf %51, %55 : vector<8x128xf32>
    %57 = vector.extract_strided_slice %5 {offsets = [24, 0], sizes = [8, 128], strides = [1, 1]} : vector<64x128xf32> to vector<8x128xf32>
    %cst_24 = arith.constant dense<0.000000e+00> : vector<8x128xf32>
    %58 = tpu.matmul %56, %6, %cst_24 {dimension_numbers = #tpu.dot_dimension_numbers<[1], [0], [0], [1], [0, 0, 1, 1], [], []>} : vector<8x128xf32>, vector<128x128xf32>, vector<8x128xf32> -> vector<8x128xf32>
    %59 = arith.addf %57, %58 : vector<8x128xf32>
    %60 = math.tanh %59 : vector<8x128xf32>
    %cst_25 = arith.constant 5.000000e-01 : f32
    %61 = vector.broadcast %cst_25 : f32 to vector<8x128xf32>
    %62 = arith.mulf %61, %60 : vector<8x128xf32>
    %cst_26 = arith.constant 5.000000e-01 : f32
    %63 = vector.broadcast %cst_26 : f32 to vector<8x128xf32>
    %64 = arith.addf %62, %63 : vector<8x128xf32>
    %c96_i32_27 = arith.constant 96 : i32
    %65 = tpu.dynamic_rotate %64 by %c96_i32_27 dim 1 : vector<8x128xf32>, i32 -> vector<8x128xf32>
    %c64_i32_28 = arith.constant 64 : i32
    %66 = tpu.dynamic_rotate %60 by %c64_i32_28 dim 1 : vector<8x128xf32>, i32 -> vector<8x128xf32>
    %c32_i32_29 = arith.constant 32 : i32
    %67 = tpu.dynamic_rotate %64 by %c32_i32_29 dim 1 : vector<8x128xf32>, i32 -> vector<8x128xf32>
    %68 = arith.mulf %65, %54 : vector<8x128xf32>
    %69 = arith.mulf %64, %66 : vector<8x128xf32>
    %70 = arith.addf %68, %69 : vector<8x128xf32>
    %71 = math.tanh %70 : vector<8x128xf32>
    %72 = arith.mulf %67, %71 : vector<8x128xf32>
    %73 = vector.extract_strided_slice %5 {offsets = [32, 0], sizes = [8, 128], strides = [1, 1]} : vector<64x128xf32> to vector<8x128xf32>
    %cst_30 = arith.constant dense<0.000000e+00> : vector<8x128xf32>
    %74 = tpu.matmul %72, %6, %cst_30 {dimension_numbers = #tpu.dot_dimension_numbers<[1], [0], [0], [1], [0, 0, 1, 1], [], []>} : vector<8x128xf32>, vector<128x128xf32>, vector<8x128xf32> -> vector<8x128xf32>
    %75 = arith.addf %73, %74 : vector<8x128xf32>
    %76 = math.tanh %75 : vector<8x128xf32>
    %cst_31 = arith.constant 5.000000e-01 : f32
    %77 = vector.broadcast %cst_31 : f32 to vector<8x128xf32>
    %78 = arith.mulf %77, %76 : vector<8x128xf32>
    %cst_32 = arith.constant 5.000000e-01 : f32
    %79 = vector.broadcast %cst_32 : f32 to vector<8x128xf32>
    %80 = arith.addf %78, %79 : vector<8x128xf32>
    %c96_i32_33 = arith.constant 96 : i32
    %81 = tpu.dynamic_rotate %80 by %c96_i32_33 dim 1 : vector<8x128xf32>, i32 -> vector<8x128xf32>
    %c64_i32_34 = arith.constant 64 : i32
    %82 = tpu.dynamic_rotate %76 by %c64_i32_34 dim 1 : vector<8x128xf32>, i32 -> vector<8x128xf32>
    %c32_i32_35 = arith.constant 32 : i32
    %83 = tpu.dynamic_rotate %80 by %c32_i32_35 dim 1 : vector<8x128xf32>, i32 -> vector<8x128xf32>
    %84 = arith.mulf %81, %70 : vector<8x128xf32>
    %85 = arith.mulf %80, %82 : vector<8x128xf32>
    %86 = arith.addf %84, %85 : vector<8x128xf32>
    %87 = math.tanh %86 : vector<8x128xf32>
    %88 = arith.mulf %83, %87 : vector<8x128xf32>
    %89 = vector.extract_strided_slice %5 {offsets = [40, 0], sizes = [8, 128], strides = [1, 1]} : vector<64x128xf32> to vector<8x128xf32>
    %cst_36 = arith.constant dense<0.000000e+00> : vector<8x128xf32>
    %90 = tpu.matmul %88, %6, %cst_36 {dimension_numbers = #tpu.dot_dimension_numbers<[1], [0], [0], [1], [0, 0, 1, 1], [], []>} : vector<8x128xf32>, vector<128x128xf32>, vector<8x128xf32> -> vector<8x128xf32>
    %91 = arith.addf %89, %90 : vector<8x128xf32>
    %92 = math.tanh %91 : vector<8x128xf32>
    %cst_37 = arith.constant 5.000000e-01 : f32
    %93 = vector.broadcast %cst_37 : f32 to vector<8x128xf32>
    %94 = arith.mulf %93, %92 : vector<8x128xf32>
    %cst_38 = arith.constant 5.000000e-01 : f32
    %95 = vector.broadcast %cst_38 : f32 to vector<8x128xf32>
    %96 = arith.addf %94, %95 : vector<8x128xf32>
    %c96_i32_39 = arith.constant 96 : i32
    %97 = tpu.dynamic_rotate %96 by %c96_i32_39 dim 1 : vector<8x128xf32>, i32 -> vector<8x128xf32>
    %c64_i32_40 = arith.constant 64 : i32
    %98 = tpu.dynamic_rotate %92 by %c64_i32_40 dim 1 : vector<8x128xf32>, i32 -> vector<8x128xf32>
    %c32_i32_41 = arith.constant 32 : i32
    %99 = tpu.dynamic_rotate %96 by %c32_i32_41 dim 1 : vector<8x128xf32>, i32 -> vector<8x128xf32>
    %100 = arith.mulf %97, %86 : vector<8x128xf32>
    %101 = arith.mulf %96, %98 : vector<8x128xf32>
    %102 = arith.addf %100, %101 : vector<8x128xf32>
    %103 = math.tanh %102 : vector<8x128xf32>
    %104 = arith.mulf %99, %103 : vector<8x128xf32>
    %105 = vector.extract_strided_slice %5 {offsets = [48, 0], sizes = [8, 128], strides = [1, 1]} : vector<64x128xf32> to vector<8x128xf32>
    %cst_42 = arith.constant dense<0.000000e+00> : vector<8x128xf32>
    %106 = tpu.matmul %104, %6, %cst_42 {dimension_numbers = #tpu.dot_dimension_numbers<[1], [0], [0], [1], [0, 0, 1, 1], [], []>} : vector<8x128xf32>, vector<128x128xf32>, vector<8x128xf32> -> vector<8x128xf32>
    %107 = arith.addf %105, %106 : vector<8x128xf32>
    %108 = math.tanh %107 : vector<8x128xf32>
    %cst_43 = arith.constant 5.000000e-01 : f32
    %109 = vector.broadcast %cst_43 : f32 to vector<8x128xf32>
    %110 = arith.mulf %109, %108 : vector<8x128xf32>
    %cst_44 = arith.constant 5.000000e-01 : f32
    %111 = vector.broadcast %cst_44 : f32 to vector<8x128xf32>
    %112 = arith.addf %110, %111 : vector<8x128xf32>
    %c96_i32_45 = arith.constant 96 : i32
    %113 = tpu.dynamic_rotate %112 by %c96_i32_45 dim 1 : vector<8x128xf32>, i32 -> vector<8x128xf32>
    %c64_i32_46 = arith.constant 64 : i32
    %114 = tpu.dynamic_rotate %108 by %c64_i32_46 dim 1 : vector<8x128xf32>, i32 -> vector<8x128xf32>
    %c32_i32_47 = arith.constant 32 : i32
    %115 = tpu.dynamic_rotate %112 by %c32_i32_47 dim 1 : vector<8x128xf32>, i32 -> vector<8x128xf32>
    %116 = arith.mulf %113, %102 : vector<8x128xf32>
    %117 = arith.mulf %112, %114 : vector<8x128xf32>
    %118 = arith.addf %116, %117 : vector<8x128xf32>
    %119 = math.tanh %118 : vector<8x128xf32>
    %120 = arith.mulf %115, %119 : vector<8x128xf32>
    %121 = vector.extract_strided_slice %5 {offsets = [56, 0], sizes = [8, 128], strides = [1, 1]} : vector<64x128xf32> to vector<8x128xf32>
    %cst_48 = arith.constant dense<0.000000e+00> : vector<8x128xf32>
    %122 = tpu.matmul %120, %6, %cst_48 {dimension_numbers = #tpu.dot_dimension_numbers<[1], [0], [0], [1], [0, 0, 1, 1], [], []>} : vector<8x128xf32>, vector<128x128xf32>, vector<8x128xf32> -> vector<8x128xf32>
    %123 = arith.addf %121, %122 : vector<8x128xf32>
    %124 = math.tanh %123 : vector<8x128xf32>
    %cst_49 = arith.constant 5.000000e-01 : f32
    %125 = vector.broadcast %cst_49 : f32 to vector<8x128xf32>
    %126 = arith.mulf %125, %124 : vector<8x128xf32>
    %cst_50 = arith.constant 5.000000e-01 : f32
    %127 = vector.broadcast %cst_50 : f32 to vector<8x128xf32>
    %128 = arith.addf %126, %127 : vector<8x128xf32>
    %c96_i32_51 = arith.constant 96 : i32
    %129 = tpu.dynamic_rotate %128 by %c96_i32_51 dim 1 : vector<8x128xf32>, i32 -> vector<8x128xf32>
    %c64_i32_52 = arith.constant 64 : i32
    %130 = tpu.dynamic_rotate %124 by %c64_i32_52 dim 1 : vector<8x128xf32>, i32 -> vector<8x128xf32>
    %c32_i32_53 = arith.constant 32 : i32
    %131 = tpu.dynamic_rotate %128 by %c32_i32_53 dim 1 : vector<8x128xf32>, i32 -> vector<8x128xf32>
    %132 = arith.mulf %129, %118 : vector<8x128xf32>
    %133 = arith.mulf %128, %130 : vector<8x128xf32>
    %134 = arith.addf %132, %133 : vector<8x128xf32>
    %135 = math.tanh %134 : vector<8x128xf32>
    %136 = arith.mulf %131, %135 : vector<8x128xf32>
    %c0_54 = arith.constant 0 : index
    %c0_55 = arith.constant 0 : index
    %137 = vector.load %arg4[%c0_54, %c0_55] : memref<128x128xf32, #tpu.memory_space<vmem>>, vector<128x128xf32>
    %cst_56 = arith.constant dense<0.000000e+00> : vector<8x128xf32>
    %138 = tpu.matmul %136, %137, %cst_56 {dimension_numbers = #tpu.dot_dimension_numbers<[1], [0], [0], [1], [0, 0, 1, 1], [], []>} : vector<8x128xf32>, vector<128x128xf32>, vector<8x128xf32> -> vector<8x128xf32>
    %c0_57 = arith.constant 0 : index
    %c0_58 = arith.constant 0 : index
    %139 = vector.load %arg5[%c0_57, %c0_58] : memref<1x128xf32, #tpu.memory_space<vmem>>, vector<1x128xf32>
    %140 = vector.broadcast %139 : vector<1x128xf32> to vector<8x128xf32>
    %141 = arith.addf %138, %140 : vector<8x128xf32>
    %cst_59 = arith.constant 0.000000e+00 : f32
    %142 = vector.broadcast %cst_59 : f32 to vector<8x128xf32>
    %143 = arith.maximumf %141, %142 : vector<8x128xf32>
    %c0_60 = arith.constant 0 : index
    %c0_61 = arith.constant 0 : index
    %144 = vector.load %arg6[%c0_60, %c0_61] : memref<8x128xf32, #tpu.memory_space<vmem>>, vector<8x128xf32>
    tpu.vector_store %arg6[%c0_60, %c0_61], %143 {strides = array<i32>} : memref<8x128xf32, #tpu.memory_space<vmem>>, vector<8x128xf32>,
    return
  }
}

</mosaic_0001>

<bundles_post_ra>
// kernel: forward.1
= control target key start
LH: loop header
LB: loop body
LE: loop exit
PB: predicated region body
PF: predicated region fallthrough
CT: control target
= control target key end

     0   :  { %11 = vsyncpa [#allocation3], 0  ;;  %s2190_s0 = inlined_call_operand.vmem [shape: f32[64,16], index: 0, kind: input, shape index: {}]   ;;  %s2191_s1 = inlined_call_operand.hbm [shape: f32[16,128], index: 1, kind: input, shape index: {}]   ;;  %s2192_s2 = inlined_call_operand.hbm [shape: f32[128,128], index: 2, kind: input, shape index: {}]   ;;  %s2193_s3 = inlined_call_operand.vmem [shape: f32[1,128], index: 3, kind: input, shape index: {}]   ;;  %s2194_s4 = inlined_call_operand.vmem [shape: f32[128,128], index: 4, kind: input, shape index: {}]   ;;  %s2195_s5 = inlined_call_operand.vmem [shape: f32[1,128], index: 5, kind: input, shape index: {}]   ;;  %s2196_s6 = inlined_call_operand.vmem [shape: f32[8,128], index: 6, kind: output, shape index: {}]  }
   0x1   :  { %12 = vsyncpa [#allocation5], 0  ;;  %s1809_s21 = smov [#allocation2]   ;;  %s1761_s25 = scalar_lea.hbm %s2191_s1, 256 }
   0x2   :  { %s20_s22 = sshll.u32 %s1809_s21, 4  ;;  %p1762_p0 = scmp.ne.s32.totalorder %s2191_s1, %s1761_s25  ;;  %s21_s22 = int_to_ptr.vmem [resolvable:$true] %s20_s22 }
   0x3   :  { %p1765_p1 = scmp.lt.u32.totalorder %s1761_s25, %s2191_s1 }
   0x5   :  { %p1767_p2 = pnand %p1765_p1, %p1762_p0 }
   0x7   :  { %1770 = shalt.err (!%p1767_p2)
}
   0x8   :  { %s1771_s30 = scalar_lea.vmem %s21_s22, 256  ;;  %p1776_p4 = scmp.lt.s32.totalorder %s21_s22, %s21_s22 }
   0x9   :  { %p1772_p3 = scmp.ne.s32.totalorder %s21_s22, %s1771_s30  ;;  %p1777_p5 = scmp.lt.s32.totalorder %s1771_s30, %s1771_s30 }
   0xb   :  { %p1778_p6 = por %p1777_p5, %p1776_p4 }
   0xd   :  { %p1779_p7 = pnand %p1778_p6, %p1772_p3 }
   0xf   :  { %1782 = shalt.err (!%p1779_p7)
}
  0x10   :  { %s1810_s7 = smov 128   ;;  %s1811_s8 = smov 8  }
  0x11   :  { %26 = dma.hbm_to_vmem [thread:$0]  %s2191_s1, 256, %s21_s22, [#allocation3], %s1810_s7, %s1810_s7, %s1811_s8  }
  0x12   :  { %s1812_s11 = smov [#allocation4]   ;;  %s1783_s15 = scalar_lea.hbm %s2192_s2, 2048 }
  0x13   :  { %s32_s12 = sshll.u32 %s1812_s11, 4  ;;  %p1784_p8 = scmp.ne.s32.totalorder %s2192_s2, %s1783_s15  ;;  %s33_s12 = int_to_ptr.vmem [resolvable:$true] %s32_s12 }
  0x14   :  { %p1787_p9 = scmp.lt.u32.totalorder %s1783_s15, %s2192_s2 }
  0x16   :  { %p1789_p10 = pnand %p1787_p9, %p1784_p8 }
  0x18   :  { %1792 = shalt.err (!%p1789_p10)
}
  0x19   :  { %s1793_s20 = scalar_lea.vmem %s33_s12, 2048  ;;  %p1798_p12 = scmp.lt.s32.totalorder %s33_s12, %s33_s12 }
  0x1a   :  { %p1794_p11 = scmp.ne.s32.totalorder %s33_s12, %s1793_s20  ;;  %p1799_p13 = scmp.lt.s32.totalorder %s1793_s20, %s1793_s20 }
  0x1c   :  { %p1800_p0 = por %p1799_p13, %p1798_p12 }
  0x1e   :  { %p1801_p1 = pnand %p1800_p0, %p1794_p11 }
  0x20   :  { %1804 = shalt.err (!%p1801_p1)
}
  0x21   :  { %38 = dma.hbm_to_vmem [thread:$0]  %s2192_s2, 2048, %s33_s12, [#allocation5], %s1810_s7, %s1810_s7, %s1811_s8  }
  0x22   :  { %1805 = dma.done.wait [#allocation3], 256  }
  0x23   :  { %1806 = vsyncadd [#allocation3], 4294967040 }
  0x24   :  { %1807 = dma.done.wait [#allocation5], 2048  }
  0x25   :  { %1808 = vsyncadd [#allocation5], 4294965248  ;;  %v1813_v0 = vmov 0.0|0.0   ;;  %vm1814_vm0 = vmmov 0   ;;  %v1815_v1 = vmov 0.0   ;;  %v198_v2 = vld [vmem:[#allocation4] sm:$0xff] }
  0x26   :  { %1503 = vmatprep.subr.bf16.mxu1 %v1813_v0  ;;  %1216 = vmatprep.mubr.msk.f32.mxu1 %vm1814_vm0, %v1815_v1  ;;  %v199_v3 = vld [vmem:[#allocation4 + $0x8] sm:$0xff]  ;;  %v200_v4 = vld [vmem:[#allocation4 + $0x10] sm:$0xff]  ;;  %v201_v6 = vld [vmem:[#allocation4 + $0x18] sm:$0xff]  ;;  %vm68_vm1 = vcmask 130048   ;;  %s1816_s12 = smov 32   ;;  %s1817_s13 = smov 96  }
  0x27   :  { %v1881_v5 = vpack.c.bf16 %v199_v3, %v198_v2  ;;  %v1884_v7 = vpack.c.bf16 %v201_v6, %v200_v4  ;;  %v202_v8 = vld [vmem:[#allocation4 + $0x20] sm:$0xff]  ;;  %v203_v9 = vld [vmem:[#allocation4 + $0x28] sm:$0xff]  ;;  %v59_v10 = vld [vmem:[#allocation2] sm:$0xff]  ;;  %s1818_s16 = smov 64  }
  0x28   :  { %v60_v11 = vld [vmem:[#allocation2 + $0x8] sm:$0xff]  ;;  %v51_v13 = vld [vmem:[%s2190_s0] sm:$0xff]  ;;  %v1892_v14 = vpack.c.bf16 %v203_v9, %v202_v8  ;;  %v206_v19 = vld [vmem:[#allocation4 + $0x40] sm:$0xff] }
  0x29   :  { %1505 = vmatpush3.bf16.msra.mxu1 %v1881_v5  ;;  %v1499_v12 = vpack.c.bf16 %v60_v11, %v59_v10  ;;  %1172 = vmatprep.mubr.msk.f32.mxu0 %vm68_vm1, %v51_v13  ;;  %v204_v15 = vld [vmem:[#allocation4 + $0x30] sm:$0xff]  ;;  %v205_v16 = vld [vmem:[#allocation4 + $0x38] sm:$0xff]  ;;  %v207_v20 = vld [vmem:[#allocation4 + $0x48] sm:$0xff] }
  0x2a   :  { %1506 = vmatprep.subr.bf16.mxu1 %v1813_v0  ;;  %v52_v17 = vld [vmem:[%s2190_s0 + $0x8] sm:$0xff]  ;;  %v1900_v18 = vpack.c.bf16 %v205_v16, %v204_v15  ;;  %v1907_v21 = vpack.c.bf16 %v207_v20, %v206_v19  ;;  %v208_v22 = vld [vmem:[#allocation4 + $0x50] sm:$0xff]  ;;  %v210_v25 = vld [vmem:[#allocation4 + $0x60] sm:$0xff] }
  0x2b   :  { %1500 = vmatprep.subr.bf16.mxu0 %v1499_v12  ;;  %v209_v23 = vld [vmem:[#allocation4 + $0x58] sm:$0xff]  ;;  %v211_v26 = vld [vmem:[#allocation4 + $0x68] sm:$0xff]  ;;  %v212_v28 = vld [vmem:[#allocation4 + $0x70] sm:$0xff] }
  0x2c   :  { %1502 = vmatpush3.bf16.msra.mxu0 %v1499_v12  ;;  %v1913_v24 = vpack.c.bf16 %v209_v23, %v208_v22  ;;  %v1919_v27 = vpack.c.bf16 %v211_v26, %v210_v25  ;;  %v213_v29 = vld [vmem:[#allocation4 + $0x78] sm:$0xff]  ;;  %v1962_v33 = vld [vmem:[%s2193_s3] ss:$0 sm:$0xff]  ;;  %v53_v38 = vld [vmem:[%s2190_s0 + $0x10] sm:$0xff] }
  0x2d   :  { %1508 = vmatpush3.bf16.msra.mxu1 %v1884_v7  ;;  %1527 = vmatprep.subr.bf16.mxu0 %v1813_v0  ;;  %v1925_v30 = vpack.c.bf16 %v213_v29, %v212_v28  ;;  %v54_v39 = vld [vmem:[%s2190_s0 + $0x18] sm:$0xff]  ;;  %v55_v41 = vld [vmem:[%s2190_s0 + $0x20] sm:$0xff]  ;;  %v56_v43 = vld [vmem:[%s2190_s0 + $0x28] sm:$0xff] }
  0x2e   :  { %1509 = vmatprep.subr.bf16.mxu1 %v1813_v0  ;;  %v57_v45 = vld [vmem:[%s2190_s0 + $0x30] sm:$0xff]  ;;  %v58_v46 = vld [vmem:[%s2190_s0 + $0x38] sm:$0xff] }
  0x2f   :  { %1173 = vmatmul.mubr.msk.f32.vlgmr.msra.gmra.mrb[0].mxu0 %vm68_vm1, %v52_v17 }
  0x30   :  { %1529 = vmatpush3.bf16.msra.mxu0 %v1881_v5  ;;  %1175 = vmatprep.mubr.msk.f32.mxu0 %vm68_vm1, %v53_v38 }
  0x31   :  { %1511 = vmatpush3.bf16.msra.mxu1 %v1892_v14  ;;  %1530 = vmatprep.subr.bf16.mxu0 %v1813_v0 }
  0x32   :  { %1512 = vmatprep.subr.bf16.mxu1 %v1813_v0 }
  0x33   :  { %1176 = vmatmul.mubr.msk.f32.gmra.mrb[2].mxu0 %vm68_vm1, %v54_v39 }
  0x34   :  { %1532 = vmatpush3.bf16.msra.mxu0 %v1884_v7  ;;  %1178 = vmatprep.mubr.msk.f32.mxu0 %vm68_vm1, %v55_v41 }
  0x35   :  { %1514 = vmatpush3.bf16.msra.mxu1 %v1900_v18  ;;  %1533 = vmatprep.subr.bf16.mxu0 %v1813_v0 }
  0x36   :  { %1515 = vmatprep.subr.bf16.mxu1 %v1813_v0 }
  0x37   :  { %1179 = vmatmul.mubr.msk.f32.gmra.mrb[4].mxu0 %vm68_vm1, %v56_v43 }
  0x38   :  { %1535 = vmatpush3.bf16.msra.mxu0 %v1892_v14  ;;  %1181 = vmatprep.mubr.msk.f32.mxu0 %vm68_vm1, %v57_v45 }
  0x39   :  { %1517 = vmatpush3.bf16.msra.mxu1 %v1907_v21  ;;  %1536 = vmatprep.subr.bf16.mxu0 %v1813_v0 }
  0x3a   :  { %1518 = vmatprep.subr.bf16.mxu1 %v1813_v0 }
  0x3b   :  { %1182 = vmatmul.mubr.msk.f32.gmra.mrb[6].mxu0 %vm68_vm1, %v58_v46 }
  0x3c   :  { %1538 = vmatpush3.bf16.msra.mxu0 %v1900_v18  ;;  %1251 = vmatprep.mubr.msk.f32.mxu0 %vm1814_vm0, %v1815_v1 }
  0x3d   :  { %1520 = vmatpush3.bf16.msra.mxu1 %v1913_v24  ;;  %1539 = vmatprep.subr.bf16.mxu0 %v1813_v0 }
  0x3e   :  { %1521 = vmatprep.subr.bf16.mxu1 %v1813_v0 }
  0x40   :  { %1541 = vmatpush3.bf16.msra.mxu0 %v1907_v21 }
  0x41   :  { %1523 = vmatpush3.bf16.msra.mxu1 %v1919_v27  ;;  %1542 = vmatprep.subr.bf16.mxu0 %v1813_v0 }
  0x42   :  { %1524 = vmatprep.subr.bf16.mxu1 %v1813_v0 }
  0x44   :  { %1544 = vmatpush3.bf16.msra.mxu0 %v1913_v24 }
  0x45   :  { %1526 = vmatpush3.bf16.msra.mxu1 %v1925_v30  ;;  %1545 = vmatprep.subr.bf16.mxu0 %v1813_v0 }
  0x46   :  { %1551 = vmatprep.subr.bf16.mxu1 %v1813_v0 }
  0x48   :  { %1217 = vmatmul.mubr.f32.vlgmr.msra.gmra.mrb[0].mxu1 %v1815_v1  ;;  %1547 = vmatpush3.bf16.msra.mxu0 %v1919_v27 }
  0x49   :  { %1553 = vmatpush3.bf16.msra.mxu1 %v1881_v5  ;;  %1286 = vmatprep.mubr.msk.f32.mxu1 %vm1814_vm0, %v1815_v1 }
  0x4a   :  { %1554 = vmatprep.subr.bf16.mxu1 %v1813_v0  ;;  %1548 = vmatprep.subr.bf16.mxu0 %v1813_v0 }
  0x4c   :  { %1550 = vmatpush3.bf16.msra.mxu0 %v1925_v30 }
  0x4d   :  { %1556 = vmatpush3.bf16.msra.mxu1 %v1884_v7  ;;  %1575 = vmatprep.subr.bf16.mxu0 %v1813_v0 }
  0x4e   :  { %1557 = vmatprep.subr.bf16.mxu1 %v1813_v0 }
  0x51   :  { %1559 = vmatpush3.bf16.msra.mxu1 %v1892_v14 }
  0x52   :  { %1560 = vmatprep.subr.bf16.mxu1 %v1813_v0 }
  0x55   :  { %1562 = vmatpush3.bf16.msra.mxu1 %v1900_v18 }
  0x56   :  { %1563 = vmatprep.subr.bf16.mxu1 %v1813_v0 }
  0x59   :  { %1565 = vmatpush3.bf16.msra.mxu1 %v1907_v21 }
  0x5a   :  { %1566 = vmatprep.subr.bf16.mxu1 %v1813_v0 }
  0x5d   :  { %1568 = vmatpush3.bf16.msra.mxu1 %v1913_v24 }
  0x5e   :  { %1569 = vmatprep.subr.bf16.mxu1 %v1813_v0 }
  0x61   :  { %1571 = vmatpush3.bf16.msra.mxu1 %v1919_v27 }
  0x62   :  { %1572 = vmatprep.subr.bf16.mxu1 %v1813_v0 }
  0x65   :  { %1574 = vmatpush3.bf16.msra.mxu1 %v1925_v30 }
  0x66   :  { %1599 = vmatprep.subr.bf16.mxu1 %v1813_v0 }
 0x102   :  { %v1957_v31 = vpop.f32.mrb[0].mxu0 }
 0x103   :  { %v159_v32 = vpop.f32.mrb[1].mxu0  ;;  %v165_v61 = vadd.f32 %v1957_v31, %v1962_v33 }
 0x104   :  { %v160_v34 = vadd.f32 %v1962_v33, %v159_v32 }
 0x106   :  { %v2012_v55 = vpop.f32.mrb[2].mxu0 }
 0x107   :  { %v169_v56 = vpop.f32.mrb[3].mxu0  ;;  %v175_v38 = vadd.f32 %v2012_v55, %v1962_v33 }
 0x108   :  { %v170_v17 = vadd.f32 %v1962_v33, %v169_v56 }
 0x10a   :  { %v2014_v57 = vpop.f32.mrb[4].mxu0 }
 0x10b   :  { %v2016_v58 = vpop.f32.mrb[5].mxu0 }
 0x10e   :  { %v2018_v59 = vpop.f32.mrb[6].mxu0 }
 0x10f   :  { %v2020_v60 = vpop.f32.mrb[7].mxu0 }
 0x11b   :  { %v280_v35 = vpop.f32.mrb[0].mxu1 }
 0x11c   :  { %v284_v36 = vadd.f32 %v280_v35, %v160_v34  ;;  %v1218_v37 = vpop.f32.mrb[1].mxu1 }
 0x11e   :  { %1729 = vtanh.f32 %v284_v36 }
 0x128   :  { %v1730_v40 = vpop.eup %1729 }
 0x129   :  { %v286_v42 = vmul.f32 0.5, %v1730_v40 }
 0x12b   :  { %v287_v44 = vadd.f32 0.5, %v286_v42 }
 0x12d   :  { %292 = vrot.lane.b32.xlu1 %v287_v44, %s1816_s12  ;;  %288 = vrot.lane.b32.xlu0 %v287_v44, %s1817_s13 }
 0x131   :  { %290 = vrot.lane.b32.xlu0 %v1730_v40, %s1818_s16 }
 0x19f   :  { %v289_v47 = vpop.permute.xlu0 %288  ;;  %v293_v53 = vpop.permute.xlu1 %292 }
 0x1a0   :  { %v294_v49 = vmul.f32 0.0, %v289_v47 }
 0x1a3   :  { %v291_v48 = vpop.permute.xlu0 %290 }
 0x1a4   :  { %v295_v50 = vmul.f32 %v291_v48, %v287_v44 }
 0x1a6   :  { %v296_v51 = vadd.f32 %v295_v50, %v294_v49 }
 0x1a8   :  { %1731 = vtanh.f32 %v296_v51 }
 0x1b2   :  { %v1732_v52 = vpop.eup %1731 }
 0x1b3   :  { %v298_v54 = vmul.f32 %v1732_v52, %v293_v53  ;;  %v180_v53 = vadd.f32 %v1962_v33, %v2016_v58 }
 0x1b5   :  { %1252 = vmatmul.mubr.f32.vlgmr.msra.gmra.mrb[8].mxu0 %v298_v54 }
 0x1b6   :  { %1577 = vmatpush3.bf16.msra.mxu0 %v1881_v5  ;;  %1321 = vmatprep.mubr.msk.f32.mxu0 %vm1814_vm0, %v1815_v1 }
 0x1b7   :  { %1578 = vmatprep.subr.bf16.mxu0 %v1813_v0 }
 0x1ba   :  { %1580 = vmatpush3.bf16.msra.mxu0 %v1884_v7 }
 0x1bb   :  { %1581 = vmatprep.subr.bf16.mxu0 %v1813_v0 }
 0x1be   :  { %1583 = vmatpush3.bf16.msra.mxu0 %v1892_v14 }
 0x1bf   :  { %1584 = vmatprep.subr.bf16.mxu0 %v1813_v0 }
 0x1c2   :  { %1586 = vmatpush3.bf16.msra.mxu0 %v1900_v18 }
 0x1c3   :  { %1587 = vmatprep.subr.bf16.mxu0 %v1813_v0 }
 0x1c6   :  { %1589 = vmatpush3.bf16.msra.mxu0 %v1907_v21 }
 0x1c7   :  { %1590 = vmatprep.subr.bf16.mxu0 %v1813_v0 }
 0x1ca   :  { %1592 = vmatpush3.bf16.msra.mxu0 %v1913_v24 }
 0x1cb   :  { %1593 = vmatprep.subr.bf16.mxu0 %v1813_v0 }
 0x1ce   :  { %1595 = vmatpush3.bf16.msra.mxu0 %v1919_v27 }
 0x1cf   :  { %1596 = vmatprep.subr.bf16.mxu0 %v1813_v0 }
 0x1d2   :  { %1598 = vmatpush3.bf16.msra.mxu0 %v1925_v30 }
 0x1d3   :  { %1623 = vmatprep.subr.bf16.mxu0 %v1813_v0 }
 0x288   :  { %v365_v62 = vpop.f32.mrb[8].mxu0 }
 0x289   :  { %v369_v63 = vadd.f32 %v365_v62, %v165_v61  ;;  %v1253_v2 = vpop.f32.mrb[9].mxu0 }
 0x28b   :  { %1733 = vtanh.f32 %v369_v63 }
 0x295   :  { %v1734_v3 = vpop.eup %1733 }
 0x296   :  { %375 = vrot.lane.b32.xlu0 %v1734_v3, %s1818_s16  ;;  %v371_v4 = vmul.f32 0.5, %v1734_v3 }
 0x298   :  { %v372_v6 = vadd.f32 0.5, %v371_v4 }
 0x29a   :  { %373 = vrot.lane.b32.xlu1 %v372_v6, %s1817_s13 }
 0x29e   :  { %377 = vrot.lane.b32.xlu1 %v372_v6, %s1816_s12 }
 0x308   :  { %v376_v8 = vpop.permute.xlu0 %375 }
 0x309   :  { %v380_v10 = vmul.f32 %v376_v8, %v372_v6 }
 0x30c   :  { %v374_v9 = vpop.permute.xlu1 %373 }
 0x30d   :  { %v379_v11 = vmul.f32 %v374_v9, %v296_v51 }
 0x30f   :  { %v381_v12 = vadd.f32 %v380_v10, %v379_v11 }
 0x310   :  { %v378_v15 = vpop.permute.xlu1 %377 }
 0x311   :  { %1735 = vtanh.f32 %v381_v12 }
 0x31b   :  { %v1736_v13 = vpop.eup %1735 }
 0x31c   :  { %v383_v16 = vmul.f32 %v1736_v13, %v378_v15 }
 0x31e   :  { %1287 = vmatmul.mubr.f32.vlgmr.msra.gmra.mrb[2].mxu1 %v383_v16 }
 0x31f   :  { %1601 = vmatpush3.bf16.msra.mxu1 %v1881_v5  ;;  %1356 = vmatprep.mubr.msk.f32.mxu1 %vm1814_vm0, %v1815_v1 }
 0x320   :  { %1602 = vmatprep.subr.bf16.mxu1 %v1813_v0 }
 0x323   :  { %1604 = vmatpush3.bf16.msra.mxu1 %v1884_v7 }
 0x324   :  { %1605 = vmatprep.subr.bf16.mxu1 %v1813_v0 }
 0x327   :  { %1607 = vmatpush3.bf16.msra.mxu1 %v1892_v14 }
 0x328   :  { %1608 = vmatprep.subr.bf16.mxu1 %v1813_v0 }
 0x32b   :  { %1610 = vmatpush3.bf16.msra.mxu1 %v1900_v18 }
 0x32c   :  { %1611 = vmatprep.subr.bf16.mxu1 %v1813_v0 }
 0x32f   :  { %1613 = vmatpush3.bf16.msra.mxu1 %v1907_v21 }
 0x330   :  { %1614 = vmatprep.subr.bf16.mxu1 %v1813_v0 }
 0x333   :  { %1616 = vmatpush3.bf16.msra.mxu1 %v1913_v24 }
 0x334   :  { %1617 = vmatprep.subr.bf16.mxu1 %v1813_v0 }
 0x337   :  { %1619 = vmatpush3.bf16.msra.mxu1 %v1919_v27 }
 0x338   :  { %1620 = vmatprep.subr.bf16.mxu1 %v1813_v0 }
 0x33b   :  { %1622 = vmatpush3.bf16.msra.mxu1 %v1925_v30 }
 0x33c   :  { %1647 = vmatprep.subr.bf16.mxu1 %v1813_v0 }
 0x3f1   :  { %v450_v19 = vpop.f32.mrb[2].mxu1 }
 0x3f2   :  { %v454_v20 = vadd.f32 %v450_v19, %v170_v17  ;;  %v1288_v22 = vpop.f32.mrb[3].mxu1  ;;  %v190_v19 = vadd.f32 %v1962_v33, %v2020_v60 }
 0x3f4   :  { %1737 = vtanh.f32 %v454_v20 }
 0x3fe   :  { %v1738_v23 = vpop.eup %1737 }
 0x3ff   :  { %460 = vrot.lane.b32.xlu1 %v1738_v23, %s1818_s16  ;;  %v456_v25 = vmul.f32 0.5, %v1738_v23 }
 0x401   :  { %v457_v26 = vadd.f32 0.5, %v456_v25 }
 0x403   :  { %458 = vrot.lane.b32.xlu0 %v457_v26, %s1817_s13 }
 0x407   :  { %462 = vrot.lane.b32.xlu0 %v457_v26, %s1816_s12 }
 0x471   :  { %v461_v28 = vpop.permute.xlu1 %460 }
 0x472   :  { %v465_v31 = vmul.f32 %v461_v28, %v457_v26 }
 0x475   :  { %v459_v29 = vpop.permute.xlu0 %458 }
 0x476   :  { %v464_v32 = vmul.f32 %v459_v29, %v381_v12 }
 0x478   :  { %v466_v34 = vadd.f32 %v465_v31, %v464_v32 }
 0x479   :  { %v463_v36 = vpop.permute.xlu0 %462 }
 0x47a   :  { %1739 = vtanh.f32 %v466_v34 }
 0x484   :  { %v1740_v35 = vpop.eup %1739 }
 0x485   :  { %v468_v37 = vmul.f32 %v1740_v35, %v463_v36 }
 0x487   :  { %1322 = vmatmul.mubr.f32.vlgmr.msra.gmra.mrb[10].mxu0 %v468_v37  ;;  %v894_v37 = vld [vmem:[%s2194_s4] sm:$0xff] }
 0x488   :  { %1625 = vmatpush3.bf16.msra.mxu0 %v1881_v5  ;;  %1391 = vmatprep.mubr.msk.f32.mxu0 %vm1814_vm0, %v1815_v1 }
 0x489   :  { %1626 = vmatprep.subr.bf16.mxu0 %v1813_v0 }
 0x48c   :  { %1628 = vmatpush3.bf16.msra.mxu0 %v1884_v7 }
 0x48d   :  { %1629 = vmatprep.subr.bf16.mxu0 %v1813_v0 }
 0x490   :  { %1631 = vmatpush3.bf16.msra.mxu0 %v1892_v14 }
 0x491   :  { %1632 = vmatprep.subr.bf16.mxu0 %v1813_v0 }
 0x494   :  { %1634 = vmatpush3.bf16.msra.mxu0 %v1900_v18 }
 0x495   :  { %1635 = vmatprep.subr.bf16.mxu0 %v1813_v0 }
 0x498   :  { %1637 = vmatpush3.bf16.msra.mxu0 %v1907_v21 }
 0x499   :  { %1638 = vmatprep.subr.bf16.mxu0 %v1813_v0 }
 0x49c   :  { %1640 = vmatpush3.bf16.msra.mxu0 %v1913_v24 }
 0x49d   :  { %1641 = vmatprep.subr.bf16.mxu0 %v1813_v0 }
 0x4a0   :  { %1643 = vmatpush3.bf16.msra.mxu0 %v1919_v27 }
 0x4a1   :  { %1644 = vmatprep.subr.bf16.mxu0 %v1813_v0 }
 0x4a4   :  { %1646 = vmatpush3.bf16.msra.mxu0 %v1925_v30 }
 0x4a5   :  { %1671 = vmatprep.subr.bf16.mxu0 %v1813_v0 }
 0x55a   :  { %v535_v39 = vpop.f32.mrb[10].mxu0 }
 0x55b   :  { %v539_v40 = vadd.f32 %v535_v39, %v175_v38  ;;  %v1323_v41 = vpop.f32.mrb[11].mxu0  ;;  %v895_v38 = vld [vmem:[%s2194_s4 + $0x8] sm:$0xff]  ;;  %v896_v39 = vld [vmem:[%s2194_s4 + $0x10] sm:$0xff] }
 0x55c   :  { %v897_v41 = vld [vmem:[%s2194_s4 + $0x18] sm:$0xff] }
 0x55d   :  { %1741 = vtanh.f32 %v539_v40  ;;  %v1696_v40 = vpack.c.bf16 %v895_v38, %v894_v37 }
 0x567   :  { %v1742_v42 = vpop.eup %1741 }
 0x568   :  { %545 = vrot.lane.b32.xlu0 %v1742_v42, %s1818_s16  ;;  %v541_v43 = vmul.f32 0.5, %v1742_v42  ;;  %v1699_v42 = vpack.c.bf16 %v897_v41, %v896_v39 }
 0x56a   :  { %v542_v44 = vadd.f32 0.5, %v541_v43  ;;  %v898_v43 = vld [vmem:[%s2194_s4 + $0x20] sm:$0xff] }
 0x56c   :  { %543 = vrot.lane.b32.xlu1 %v542_v44, %s1817_s13 }
 0x570   :  { %547 = vrot.lane.b32.xlu1 %v542_v44, %s1816_s12 }
 0x5da   :  { %v546_v45 = vpop.permute.xlu0 %545 }
 0x5db   :  { %v550_v47 = vmul.f32 %v546_v45, %v542_v44  ;;  %v899_v44 = vld [vmem:[%s2194_s4 + $0x28] sm:$0xff] }
 0x5dc   :  { %v1702_v45 = vpack.c.bf16 %v899_v44, %v898_v43 }
 0x5de   :  { %v544_v46 = vpop.permute.xlu1 %543 }
 0x5df   :  { %v549_v48 = vmul.f32 %v544_v46, %v466_v34  ;;  %v195_v46 = vadd.f32 %v2018_v59, %v1962_v33  ;;  %v903_v59 = vld [vmem:[%s2194_s4 + $0x48] sm:$0xff] }
 0x5e1   :  { %v551_v49 = vadd.f32 %v550_v47, %v549_v48  ;;  %v900_v48 = vld [vmem:[%s2194_s4 + $0x30] sm:$0xff] }
 0x5e2   :  { %v548_v51 = vpop.permute.xlu1 %547 }
 0x5e3   :  { %1743 = vtanh.f32 %v551_v49 }
 0x5ed   :  { %v1744_v50 = vpop.eup %1743 }
 0x5ee   :  { %v553_v52 = vmul.f32 %v1744_v50, %v548_v51 }
 0x5f0   :  { %1357 = vmatmul.mubr.f32.vlgmr.msra.gmra.mrb[4].mxu1 %v553_v52 }
 0x5f1   :  { %1649 = vmatpush3.bf16.msra.mxu1 %v1881_v5  ;;  %1426 = vmatprep.mubr.msk.f32.mxu1 %vm1814_vm0, %v1815_v1 }
 0x5f2   :  { %1650 = vmatprep.subr.bf16.mxu1 %v1813_v0 }
 0x5f5   :  { %1652 = vmatpush3.bf16.msra.mxu1 %v1884_v7 }
 0x5f6   :  { %1653 = vmatprep.subr.bf16.mxu1 %v1813_v0 }
 0x5f9   :  { %1655 = vmatpush3.bf16.msra.mxu1 %v1892_v14 }
 0x5fa   :  { %1656 = vmatprep.subr.bf16.mxu1 %v1813_v0 }
 0x5fd   :  { %1658 = vmatpush3.bf16.msra.mxu1 %v1900_v18 }
 0x5fe   :  { %1659 = vmatprep.subr.bf16.mxu1 %v1813_v0 }
 0x601   :  { %1661 = vmatpush3.bf16.msra.mxu1 %v1907_v21 }
 0x602   :  { %1662 = vmatprep.subr.bf16.mxu1 %v1813_v0 }
 0x605   :  { %1664 = vmatpush3.bf16.msra.mxu1 %v1913_v24 }
 0x606   :  { %1665 = vmatprep.subr.bf16.mxu1 %v1813_v0 }
 0x609   :  { %1667 = vmatpush3.bf16.msra.mxu1 %v1919_v27 }
 0x60a   :  { %1668 = vmatprep.subr.bf16.mxu1 %v1813_v0 }
 0x60d   :  { %1670 = vmatpush3.bf16.msra.mxu1 %v1925_v30 }
 0x60e   :  { %1695 = vmatprep.subr.bf16.mxu1 %v1813_v0 }
 0x6c3   :  { %v620_v54 = vpop.f32.mrb[4].mxu1 }
 0x6c4   :  { %v624_v55 = vadd.f32 %v620_v54, %v180_v53  ;;  %v1358_v56 = vpop.f32.mrb[5].mxu1  ;;  %v904_v54 = vld [vmem:[%s2194_s4 + $0x50] sm:$0xff] }
 0x6c6   :  { %1745 = vtanh.f32 %v624_v55  ;;  %v905_v55 = vld [vmem:[%s2194_s4 + $0x58] sm:$0xff] }
 0x6c7   :  { %v1711_v56 = vpack.c.bf16 %v905_v55, %v904_v54 }
 0x6d0   :  { %v1746_v61 = vpop.eup %1745 }
 0x6d1   :  { %630 = vrot.lane.b32.xlu1 %v1746_v61, %s1818_s16  ;;  %v626_v62 = vmul.f32 0.5, %v1746_v61  ;;  %v906_v61 = vld [vmem:[%s2194_s4 + $0x60] sm:$0xff] }
 0x6d3   :  { %v627_v63 = vadd.f32 0.5, %v626_v62  ;;  %v907_v62 = vld [vmem:[%s2194_s4 + $0x68] sm:$0xff] }
 0x6d5   :  { %628 = vrot.lane.b32.xlu0 %v627_v63, %s1817_s13 }
 0x6d9   :  { %632 = vrot.lane.b32.xlu0 %v627_v63, %s1816_s12 }
 0x743   :  { %v631_v2 = vpop.permute.xlu1 %630 }
 0x744   :  { %v635_v4 = vmul.f32 %v631_v2, %v627_v63  ;;  %v1714_v2 = vpack.c.bf16 %v907_v62, %v906_v61 }
 0x747   :  { %v629_v3 = vpop.permute.xlu0 %628 }
 0x748   :  { %v634_v6 = vmul.f32 %v629_v3, %v551_v49  ;;  %v901_v49 = vld [vmem:[%s2194_s4 + $0x38] sm:$0xff] }
 0x749   :  { %v1705_v52 = vpack.c.bf16 %v901_v49, %v900_v48 }
 0x74a   :  { %v636_v8 = vadd.f32 %v635_v4, %v634_v6  ;;  %v908_v6 = vld [vmem:[%s2194_s4 + $0x70] sm:$0xff] }
 0x74b   :  { %v633_v9 = vpop.permute.xlu0 %632 }
 0x74c   :  { %1747 = vtanh.f32 %v636_v8 }
 0x756   :  { %v1748_v58 = vpop.eup %1747 }
 0x757   :  { %v638_v10 = vmul.f32 %v1748_v58, %v633_v9 }
 0x759   :  { %1392 = vmatmul.mubr.f32.vlgmr.msra.gmra.mrb[12].mxu0 %v638_v10 }
 0x75a   :  { %1673 = vmatpush3.bf16.msra.mxu0 %v1881_v5  ;;  %1461 = vmatprep.mubr.msk.f32.mxu0 %vm1814_vm0, %v1815_v1  ;;  %v185_v5 = vadd.f32 %v2014_v57, %v1962_v33  ;;  %v902_v33 = vld [vmem:[%s2194_s4 + $0x40] sm:$0xff] }
 0x75b   :  { %1674 = vmatprep.subr.bf16.mxu0 %v1813_v0  ;;  %v1708_v53 = vpack.c.bf16 %v903_v59, %v902_v33 }
 0x75e   :  { %1676 = vmatpush3.bf16.msra.mxu0 %v1884_v7 }
 0x75f   :  { %1677 = vmatprep.subr.bf16.mxu0 %v1813_v0 }
 0x762   :  { %1679 = vmatpush3.bf16.msra.mxu0 %v1892_v14 }
 0x763   :  { %1680 = vmatprep.subr.bf16.mxu0 %v1813_v0 }
 0x766   :  { %1682 = vmatpush3.bf16.msra.mxu0 %v1900_v18 }
 0x767   :  { %1683 = vmatprep.subr.bf16.mxu0 %v1813_v0 }
 0x76a   :  { %1685 = vmatpush3.bf16.msra.mxu0 %v1907_v21 }
 0x76b   :  { %1686 = vmatprep.subr.bf16.mxu0 %v1813_v0 }
 0x76e   :  { %1688 = vmatpush3.bf16.msra.mxu0 %v1913_v24 }
 0x76f   :  { %1689 = vmatprep.subr.bf16.mxu0 %v1813_v0 }
 0x772   :  { %1691 = vmatpush3.bf16.msra.mxu0 %v1919_v27 }
 0x773   :  { %1692 = vmatprep.subr.bf16.mxu0 %v1813_v0 }
 0x776   :  { %1694 = vmatpush3.bf16.msra.mxu0 %v1925_v30 }
 0x82c   :  { %v705_v7 = vpop.f32.mrb[12].mxu0 }
 0x82d   :  { %v709_v14 = vadd.f32 %v705_v7, %v185_v5  ;;  %v1393_v18 = vpop.f32.mrb[13].mxu0 }
 0x82f   :  { %1749 = vtanh.f32 %v709_v14 }
 0x839   :  { %v1750_v21 = vpop.eup %1749 }
 0x83a   :  { %715 = vrot.lane.b32.xlu0 %v1750_v21, %s1818_s16  ;;  %v711_v11 = vmul.f32 0.5, %v1750_v21 }
 0x83c   :  { %v712_v24 = vadd.f32 0.5, %v711_v11  ;;  %v1004_v11 = vld [vmem:[%s2195_s5] ss:$0 sm:$0xff] }
 0x83e   :  { %713 = vrot.lane.b32.xlu1 %v712_v24, %s1817_s13 }
 0x842   :  { %717 = vrot.lane.b32.xlu1 %v712_v24, %s1816_s12 }
 0x8ac   :  { %v716_v27 = vpop.permute.xlu0 %715 }
 0x8ad   :  { %v720_v13 = vmul.f32 %v716_v27, %v712_v24 }
 0x8b0   :  { %v714_v12 = vpop.permute.xlu1 %713 }
 0x8b1   :  { %v719_v30 = vmul.f32 %v714_v12, %v636_v8  ;;  %v909_v8 = vld [vmem:[%s2194_s4 + $0x78] sm:$0xff] }
 0x8b2   :  { %v1717_v58 = vpack.c.bf16 %v909_v8, %v908_v6 }
 0x8b3   :  { %v721_v15 = vadd.f32 %v720_v13, %v719_v30 }
 0x8b4   :  { %v718_v16 = vpop.permute.xlu1 %717 }
 0x8b5   :  { %1751 = vtanh.f32 %v721_v15 }
 0x8bf   :  { %v1752_v57 = vpop.eup %1751 }
 0x8c0   :  { %v723_v17 = vmul.f32 %v1752_v57, %v718_v16 }
 0x8c2   :  { %1427 = vmatmul.mubr.f32.vlgmr.msra.gmra.mrb[6].mxu1 %v723_v17 }
 0x8c3   :  { %1496 = vmatprep.mubr.msk.f32.mxu1 %vm1814_vm0, %v1815_v1  ;;  %1697 = vmatpush3.bf16.msra.mxu1 %v1696_v40 }
 0x8c4   :  { %1698 = vmatprep.subr.bf16.mxu1 %v1813_v0 }
 0x8c7   :  { %1700 = vmatpush3.bf16.msra.mxu1 %v1699_v42 }
 0x8c8   :  { %1701 = vmatprep.subr.bf16.mxu1 %v1813_v0 }
 0x8cb   :  { %1703 = vmatpush3.bf16.msra.mxu1 %v1702_v45 }
 0x8cc   :  { %1704 = vmatprep.subr.bf16.mxu1 %v1813_v0 }
 0x8cf   :  { %1706 = vmatpush3.bf16.msra.mxu1 %v1705_v52 }
 0x8d0   :  { %1707 = vmatprep.subr.bf16.mxu1 %v1813_v0 }
 0x8d3   :  { %1709 = vmatpush3.bf16.msra.mxu1 %v1708_v53 }
 0x8d4   :  { %1710 = vmatprep.subr.bf16.mxu1 %v1813_v0 }
 0x8d7   :  { %1712 = vmatpush3.bf16.msra.mxu1 %v1711_v56 }
 0x8d8   :  { %1713 = vmatprep.subr.bf16.mxu1 %v1813_v0 }
 0x8db   :  { %1715 = vmatpush3.bf16.msra.mxu1 %v1714_v2 }
 0x8dc   :  { %1716 = vmatprep.subr.bf16.mxu1 %v1813_v0 }
 0x8df   :  { %1718 = vmatpush3.bf16.msra.mxu1 %v1717_v58 }
 0x995   :  { %v790_v20 = vpop.f32.mrb[6].mxu1 }
 0x996   :  { %v794_v22 = vadd.f32 %v790_v20, %v190_v19  ;;  %v1428_v23 = vpop.f32.mrb[7].mxu1 }
 0x998   :  { %1753 = vtanh.f32 %v794_v22 }
 0x9a2   :  { %v1754_v25 = vpop.eup %1753 }
 0x9a3   :  { %800 = vrot.lane.b32.xlu1 %v1754_v25, %s1818_s16  ;;  %v796_v26 = vmul.f32 0.5, %v1754_v25 }
 0x9a5   :  { %v797_v28 = vadd.f32 0.5, %v796_v26 }
 0x9a7   :  { %798 = vrot.lane.b32.xlu0 %v797_v28, %s1817_s13 }
 0x9ab   :  { %802 = vrot.lane.b32.xlu0 %v797_v28, %s1816_s12 }
 0xa15   :  { %v801_v29 = vpop.permute.xlu1 %800 }
 0xa16   :  { %v805_v32 = vmul.f32 %v801_v29, %v797_v28 }
 0xa19   :  { %v799_v31 = vpop.permute.xlu0 %798 }
 0xa1a   :  { %v804_v1 = vmul.f32 %v799_v31, %v721_v15 }
 0xa1c   :  { %v806_v34 = vadd.f32 %v805_v32, %v804_v1 }
 0xa1d   :  { %v803_v35 = vpop.permute.xlu0 %802 }
 0xa1e   :  { %1755 = vtanh.f32 %v806_v34 }
 0xa28   :  { %v1756_v60 = vpop.eup %1755 }
 0xa29   :  { %v808_v36 = vmul.f32 %v1756_v60, %v803_v35 }
 0xa2b   :  { %1462 = vmatmul.mubr.f32.vlgmr.msra.gmra.mrb[14].mxu0 %v808_v36 }
 0xafe   :  { %v875_v47 = vpop.f32.mrb[14].mxu0 }
 0xaff   :  { %v879_v50 = vadd.f32 %v875_v47, %v195_v46  ;;  %v1463_v51 = vpop.f32.mrb[15].mxu0 }
 0xb01   :  { %1757 = vtanh.f32 %v879_v50 }
 0xb0b   :  { %v1758_v63 = vpop.eup %1757 }
 0xb0c   :  { %885 = vrot.lane.b32.xlu0 %v1758_v63, %s1818_s16  ;;  %v881_v3 = vmul.f32 0.5, %v1758_v63 }
 0xb0e   :  { %v882_v4 = vadd.f32 0.5, %v881_v3 }
 0xb10   :  { %883 = vrot.lane.b32.xlu1 %v882_v4, %s1817_s13 }
 0xb14   :  { %887 = vrot.lane.b32.xlu1 %v882_v4, %s1816_s12 }
 0xb7e   :  { %v886_v9 = vpop.permute.xlu0 %885 }
 0xb7f   :  { %v890_v5 = vmul.f32 %v886_v9, %v882_v4 }
 0xb82   :  { %v884_v10 = vpop.permute.xlu1 %883 }
 0xb83   :  { %v889_v7 = vmul.f32 %v884_v10, %v806_v34 }
 0xb85   :  { %v891_v14 = vadd.f32 %v890_v5, %v889_v7 }
 0xb86   :  { %v888_v18 = vpop.permute.xlu1 %887 }
 0xb87   :  { %1759 = vtanh.f32 %v891_v14 }
 0xb91   :  { %v1760_v0 = vpop.eup %1759 }
 0xb92   :  { %v893_v21 = vmul.f32 %v1760_v0, %v888_v18 }
 0xb94   :  { %1497 = vmatmul.mubr.f32.vlgmr.msra.gmra.mrb[8].mxu1 %v893_v21 }
 0xc67   :  { %v983_v24 = vpop.f32.mrb[8].mxu1 }
 0xc68   :  { %v984_v27 = vadd.f32 %v1004_v11, %v983_v24  ;;  %v1498_v12 = vpop.f32.mrb[9].mxu1 }
 0xc6a   :  { %v987_v13 = vmax.f32 %v984_v27, 0.0 }
 0xc6c   :  { %988 = vst [vmem:[%s2196_s6] sm:$0xff] %v987_v13 }
 0xc6d   :  { %993 = vsyncpa [#allocation3], 1 }
 0xc6e   :  { %994 = vsyncpa [#allocation5], 1 }

</bundles_post_ra>
